<compile_context>
chip_gen: v7x
topology: tpu7x:2x2x1
jax: 0.10.0
libtpu: 0.0.40
codegen_flags: <defaults>
</compile_context>

<pallas_src>
import jax
import jax.numpy as jnp
import numpy as np
from jax.experimental import pallas as pl
from jax.experimental.pallas import tpu as pltpu


def spblock_kernel(x_ref, s_ref, wc_ref, bc_ref, w3_ref, b3_ref, o_ref):
    # x_ref : (Nb, H, P)        bf16 lane-dense input slab (P = pad128(W*C))
    # s_ref : (3, M, M)         bf16 {up-shift, down-shift, 1/H mean} operators
    # wc_ref: (4P, W*mid)       bf16 fused conv1+conv2 weight (BN scale folded)
    # bc_ref: (1, W*mid)        f32 combined BN1+BN2 shift
    # w3_ref: (W*mid, W*out)    bf16 block-diagonal 1x1-conv weight
    # b3_ref: (1, W*out)        f32 conv3 bias (tiled over W)
    # o_ref : (Nb, H, W*out)    f32 lane-dense output slab
    f32 = jnp.float32
    nb, h, p = x_ref.shape
    m = nb * h
    xf = x_ref[...].reshape(m, p)                                    # (M, P) bf16

    # +-1 H-shifts (zero padded per image) and per-image H-mean broadcast as
    # tiny matmuls against grid-invariant operators (no per-step iota/compares;
    # selections are exact in bf16, accumulation is f32).
    up = jnp.dot(s_ref[0], xf, preferred_element_type=f32).astype(xf.dtype)
    dn = jnp.dot(s_ref[1], xf, preferred_element_type=f32).astype(xf.dtype)
    mb = jnp.dot(s_ref[2], xf, preferred_element_type=f32).astype(xf.dtype)

    # One fused MXU matmul covers both strip-conv paths (pooling, W-broadcast,
    # W-taps and BN scales are all folded into wc_ref); bias + ReLU in f32.
    xc = jnp.concatenate([up, xf, dn, mb], axis=1)                   # (M, 4P) bf16
    a = jnp.dot(xc, wc_ref[...], preferred_element_type=f32) + bc_ref[...]
    a = jnp.maximum(a, 0.0)                                          # (M, W*mid) f32

    # 1x1 conv as a block-diagonal matmul landing directly in the lane-dense
    # (H, W*out) output layout; sigmoid on the EUP in f32.
    z = jnp.dot(a.astype(w3_ref.dtype), w3_ref[...],
                preferred_element_type=f32) + b3_ref[...]
    o_ref[...] = jax.nn.sigmoid(z).reshape(nb, h, o_ref.shape[2])


def pick_batch_block(n, h, target_rows=256):
    """Images per grid step: fill the MXU (M = nb*h -> ~256) but keep the grid
    length >= 2 so both v7x TensorCores get work."""
    divisors = [d for d in range(1, n + 1) if n % d == 0 and d * h <= target_rows]
    if not divisors:
        return 1
    multi = [d for d in divisors if n // d >= 2]
    return max(multi) if multi else max(divisors)


def fold_spblock_params(w1_pt, w2_pt, w3_pt, b3_pt,
                        g1, be1, m1, v1, g2, be2, m2, v2,
                        *, H, W, eps=1e-5, nb=1):
    """Precompute (once per parameter set) all folded / repacked operands.

    All folding is done in f32; only the final MXU operands are cast to bf16.
    """
    f32, bf16 = jnp.float32, jnp.bfloat16
    mid, C = int(w1_pt.shape[0]), int(w1_pt.shape[1])
    out = int(w3_pt.shape[0])
    WC = W * C
    P = ((WC + 127) // 128) * 128
    pad = P - WC

    # Eval-mode BatchNorm as per-channel scale/shift.
    # TODO(synk): training-mode BN (batch statistics + running-stat update) not modeled.
    s1v = g1 / jnp.sqrt(v1 + eps)
    s2v = g2 / jnp.sqrt(v2 + eps)
    b1v = be1 - m1 * s1v
    b2v = be2 - m2 * s2v

    # conv1 (3,1) on the W-strip-pool: fold 1/W pooling, broadcast over W and
    # BN1 scale.  blk[t, w'*C+c, w*mid+m] = w1[m,c,t] * s1v[m] / W.
    k1 = jnp.transpose(w1_pt[:, :, :, 0], (2, 1, 0)) * (s1v[None, None, :] / float(W))
    blk = jnp.broadcast_to(k1[:, None, :, :], (3, W, C, mid)).reshape(3, WC, mid)
    blk = jnp.broadcast_to(blk[:, :, None, :], (3, WC, W, mid)).reshape(3, WC, W * mid)
    if pad:
        blk = jnp.pad(blk, ((0, 0), (0, pad), (0, 0)))

    # conv2 (1,3) on the H-strip-pool: banded W-taps + BN2 scale (the 1/H
    # pooling lives in the mean operator below).
    # w2f[w'*C+c, w*mid+m] = w2[m,c,t]*s2v[m] with t = w'-w+1 in {0,1,2}.
    k2 = jnp.transpose(w2_pt[:, :, 0, :], (2, 1, 0)) * s2v[None, None, :]
    band = jnp.zeros((W, C, W, mid), f32)
    for t in range(3):
        e = jnp.eye(W, W, k=1 - t, dtype=f32)     # e[w', w] = 1 iff w' == w + t - 1
        band = band + jnp.einsum('uw,cm->ucwm', e, k2[t])
    w2f = band.reshape(WC, W * mid)
    if pad:
        w2f = jnp.pad(w2f, ((0, pad), (0, 0)))

    # Fused weight: contraction layout [up | x | dn | meanH(x)] -> (4P, W*mid).
    wc = jnp.concatenate([blk[0], blk[1], blk[2], w2f], axis=0)

    # Combined BN1+BN2 shift, tiled over W.
    bc = jnp.tile((b1v + b2v)[None, :], (1, W))                       # (1, W*mid)

    # conv3 (1x1) as block-diagonal weight -> lane-dense output layout.
    k3 = jnp.transpose(w3_pt[:, :, 0, 0], (1, 0))                     # (mid, out)
    w3f = jnp.einsum('uw,mo->umwo', jnp.eye(W, dtype=f32), k3).reshape(W * mid, W * out)
    b3f = jnp.tile(b3_pt[None, :], (1, W))                            # (1, W*out)

    # Per-image H-shift (+-1, zero padded) and H-mean operators, block-diagonal
    # over the nb images packed into one grid step (exact in bf16: 0/1 and 1/H).
    s_up = jnp.kron(jnp.eye(nb, dtype=f32), jnp.eye(H, k=-1, dtype=f32))
    s_dn = jnp.kron(jnp.eye(nb, dtype=f32), jnp.eye(H, k=1, dtype=f32))
    s_mn = jnp.kron(jnp.eye(nb, dtype=f32), jnp.full((H, H), 1.0 / H, dtype=f32))
    shifts = jnp.stack([s_up, s_dn, s_mn]).astype(bf16)               # (3, nb*H, nb*H)

    return dict(shifts=shifts, wc=wc.astype(bf16), bc=bc.astype(f32),
                w3f=w3f.astype(bf16), b3f=b3f.astype(f32),
                P=P, H=H, W=W, C=C, mid=mid, out=out, nb=nb)


def spblock_apply_flat(x_flat, params):
    """Run the fused kernel on the lane-dense slab x_flat (N, H, P) bf16.

    Returns the lane-dense output slab (N, H, W*out) f32.
    """
    N, H, P = x_flat.shape
    nb, W, mid, out = params["nb"], params["W"], params["mid"], params["out"]
    M = nb * H
    assert N % nb == 0

    return pl.pallas_call(
        spblock_kernel,
        out_shape=jax.ShapeDtypeStruct((N, H, W * out), jnp.float32),
        grid_spec=pltpu.PrefetchScalarGridSpec(
            num_scalar_prefetch=0,
            grid=(N // nb,),
            in_specs=[
                pl.BlockSpec((nb, H, P), lambda n: (n, 0, 0)),          # x (lane-dense, bf16)
                pl.BlockSpec((3, M, M), lambda n: (0, 0, 0)),           # shift/mean operators
                pl.BlockSpec((4 * P, W * mid), lambda n: (0, 0)),       # fused conv1+conv2 weight
                pl.BlockSpec((1, W * mid), lambda n: (0, 0)),           # combined BN shift
                pl.BlockSpec((W * mid, W * out), lambda n: (0, 0)),     # conv3 block-diag weight
                pl.BlockSpec((1, W * out), lambda n: (0, 0)),           # conv3 bias (tiled)
            ],
            out_specs=pl.BlockSpec((nb, H, W * out), lambda n: (n, 0, 0)),
        ),
        compiler_params=pltpu.CompilerParams(
            dimension_semantics=("parallel",)),
    )(x_flat, params["shifts"], params["wc"], params["bc"],
      params["w3f"], params["b3f"])


def nchw_to_flat(x_nchw, P):
    """NCHW -> lane-dense bf16 slab x[n, h, w*C+c] (zero-padded to P lanes)."""
    N, C, H, W = x_nchw.shape
    WC = W * C
    x_flat = jnp.transpose(x_nchw, (0, 2, 3, 1)).reshape(N, H, WC)
    if P > WC:
        x_flat = jnp.pad(x_flat, ((0, 0), (0, 0), (0, P - WC)))
    return x_flat.astype(jnp.bfloat16)


def flat_to_nchw(out_flat, W, out):
    N, H, _ = out_flat.shape
    return jnp.transpose(out_flat.reshape(N, H, W, out), (0, 3, 1, 2))


def spblock_forward(x_nchw, params):
    """NCHW convenience adapter around the lane-dense kernel."""
    out_flat = spblock_apply_flat(nchw_to_flat(x_nchw, params["P"]), params)
    return flat_to_nchw(out_flat, params["W"], params["out"])


def spblock_reference(x, w1_pt, w2_pt, w3_pt, b3_pt,
                      g1, be1, m1, v1, g2, be2, m2, v2, eps=1e-5):
    """Pure-JAX reference mirroring the PyTorch module (eval-mode BN)."""
    N, C, H, W = x.shape
    dn = ('NCHW', 'OIHW', 'NCHW')
    hp = jax.lax.Precision.HIGHEST
    x1 = jnp.mean(x, axis=3, keepdims=True)
    x1 = jax.lax.conv_general_dilated(x1, w1_pt, (1, 1), ((1, 1), (0, 0)),
                                      dimension_numbers=dn, precision=hp)
    x1 = (x1 - m1[None, :, None, None]) * (g1 / jnp.sqrt(v1 + eps))[None, :, None, None] \
         + be1[None, :, None, None]
    x1 = jnp.broadcast_to(x1, (N, x1.shape[1], H, W))
    x2 = jnp.mean(x, axis=2, keepdims=True)
    x2 = jax.lax.conv_general_dilated(x2, w2_pt, (1, 1), ((0, 0), (1, 1)),
                                      dimension_numbers=dn, precision=hp)
    x2 = (x2 - m2[None, :, None, None]) * (g2 / jnp.sqrt(v2 + eps))[None, :, None, None] \
         + be2[None, :, None, None]
    x2 = jnp.broadcast_to(x2, (N, x2.shape[1], H, W))
    y = jnp.maximum(x1 + x2, 0.0)
    z = jax.lax.conv_general_dilated(y, w3_pt, (1, 1), ((0, 0), (0, 0)),
                                     dimension_numbers=dn, precision=hp)
    z = z + b3_pt[None, :, None, None]
    return 1.0 / (1.0 + jnp.exp(-z))


if __name__ == "__main__":
    N, C_in, C_out, H, W = 2, 4, 8, 16, 16
    mid = C_out                                   # midplanes = outplanes
    eps = 1e-5

    key = jax.random.PRNGKey(0)
    ks = jax.random.split(key, 13)

    # PyTorch-shaped parameters (deterministic, synthetic).
    w1_pt = 0.2 * jax.random.normal(ks[0], (mid, C_in, 3, 1), jnp.float32)
    w2_pt = 0.2 * jax.random.normal(ks[1], (mid, C_in, 1, 3), jnp.float32)
    w3_pt = 0.2 * jax.random.normal(ks[2], (C_out, mid, 1, 1), jnp.float32)
    b3_pt = 0.1 * jax.random.normal(ks[3], (C_out,), jnp.float32)
    # BatchNorm params (inference mode with synthetic running stats).
    g1 = 1.0 + 0.1 * jax.random.normal(ks[4], (mid,), jnp.float32)
    be1 = 0.1 * jax.random.normal(ks[5], (mid,), jnp.float32)
    m1 = 0.1 * jax.random.normal(ks[6], (mid,), jnp.float32)
    v1 = 1.0 + 0.1 * jnp.abs(jax.random.normal(ks[7], (mid,), jnp.float32))
    g2 = 1.0 + 0.1 * jax.random.normal(ks[8], (mid,), jnp.float32)
    be2 = 0.1 * jax.random.normal(ks[9], (mid,), jnp.float32)
    m2 = 0.1 * jax.random.normal(ks[10], (mid,), jnp.float32)
    v2 = 1.0 + 0.1 * jnp.abs(jax.random.normal(ks[11], (mid,), jnp.float32))

    x = jax.random.normal(ks[12], (N, C_in, H, W), jnp.float32)

    # Fold/repack parameters ONCE; reuse across forward calls.
    nb = pick_batch_block(N, H)
    params = fold_spblock_params(w1_pt, w2_pt, w3_pt, b3_pt,
                                 g1, be1, m1, v1, g2, be2, m2, v2,
                                 H=H, W=W, eps=eps, nb=nb)
    params = jax.tree_util.tree_map(
        lambda a: jax.block_until_ready(a) if isinstance(a, jax.Array) else a, params)

    out = spblock_forward(x, params)
    out = jax.block_until_ready(out)

    ref = spblock_reference(x, w1_pt, w2_pt, w3_pt, b3_pt,
                            g1, be1, m1, v1, g2, be2, m2, v2, eps)
    ref = jax.block_until_ready(ref)

    assert out.shape == (N, C_out, H, W)
    np.testing.assert_allclose(np.asarray(out), np.asarray(ref), atol=2e-3, rtol=2e-3)
    print("KERNEL_OK")
</pallas_src>

<mosaic_0001>
module attributes {stable_mosaic.version = 11 : i64} {
  func.func @spblock_kernel(%arg0: i32, %arg1: memref<1x16x128xbf16, #tpu.memory_space<vmem>>, %arg2: memref<3x16x16xbf16, #tpu.memory_space<vmem>>, %arg3: memref<512x128xbf16, #tpu.memory_space<vmem>>, %arg4: memref<1x128xf32, #tpu.memory_space<vmem>>, %arg5: memref<128x128xbf16, #tpu.memory_space<vmem>>, %arg6: memref<1x128xf32, #tpu.memory_space<vmem>>, %arg7: memref<1x16x128xf32, #tpu.memory_space<vmem>>) attributes {dimension_semantics = [#tpu.dimension_semantics<parallel>], iteration_bounds = array<i64: 2>, scalar_prefetch = 0 : i64, scratch_operands = 0 : i64, tpu.core_type = #tpu.core_type<tc>, window_params = [{transform_indices = @transform_0, window_bounds = array<i64: 1, 16, 128>}, {pipeline_mode = #tpu.pipeline_mode<synchronous>, transform_indices = @transform_1, window_bounds = array<i64: 3, 16, 16>}, {pipeline_mode = #tpu.pipeline_mode<synchronous>, transform_indices = @transform_2, window_bounds = array<i64: 512, 128>}, {pipeline_mode = #tpu.pipeline_mode<synchronous>, transform_indices = @transform_3, window_bounds = array<i64: 1, 128>}, {pipeline_mode = #tpu.pipeline_mode<synchronous>, transform_indices = @transform_4, window_bounds = array<i64: 128, 128>}, {pipeline_mode = #tpu.pipeline_mode<synchronous>, transform_indices = @transform_5, window_bounds = array<i64: 1, 128>}, {transform_indices = @transform_6, window_bounds = array<i64: 1, 16, 128>}]} {
    %c0 = arith.constant 0 : index
    %c0_0 = arith.constant 0 : index
    %c0_1 = arith.constant 0 : index
    %0 = vector.load %arg1[%c0, %c0_0, %c0_1] : memref<1x16x128xbf16, #tpu.memory_space<vmem>>, vector<1x16x128xbf16>
    %1 = vector.shape_cast %0 : vector<1x16x128xbf16> to vector<16x128xbf16>
    %c0_2 = arith.constant 0 : index
    %c0_3 = arith.constant 0 : index
    %c0_4 = arith.constant 0 : index
    %2 = vector.load %arg2[%c0_2, %c0_3, %c0_4] : memref<3x16x16xbf16, #tpu.memory_space<vmem>>, vector<1x16x16xbf16>
    %3 = vector.shape_cast %2 : vector<1x16x16xbf16> to vector<16x16xbf16>
    %cst = arith.constant dense<0.000000e+00> : vector<16x128xf32>
    %4 = tpu.matmul %3, %1, %cst {dimension_numbers = #tpu.dot_dimension_numbers<[1], [0], [0], [1], [0, 0, 1, 1], [], []>} : vector<16x16xbf16>, vector<16x128xbf16>, vector<16x128xf32> -> vector<16x128xf32>
    %5 = arith.truncf %4 : vector<16x128xf32> to vector<16x128xbf16>
    %c1 = arith.constant 1 : index
    %c0_5 = arith.constant 0 : index
    %c0_6 = arith.constant 0 : index
    %6 = vector.load %arg2[%c1, %c0_5, %c0_6] : memref<3x16x16xbf16, #tpu.memory_space<vmem>>, vector<1x16x16xbf16>
    %7 = vector.shape_cast %6 : vector<1x16x16xbf16> to vector<16x16xbf16>
    %cst_7 = arith.constant dense<0.000000e+00> : vector<16x128xf32>
    %8 = tpu.matmul %7, %1, %cst_7 {dimension_numbers = #tpu.dot_dimension_numbers<[1], [0], [0], [1], [0, 0, 1, 1], [], []>} : vector<16x16xbf16>, vector<16x128xbf16>, vector<16x128xf32> -> vector<16x128xf32>
    %9 = arith.truncf %8 : vector<16x128xf32> to vector<16x128xbf16>
    %c2 = arith.constant 2 : index
    %c0_8 = arith.constant 0 : index
    %c0_9 = arith.constant 0 : index
    %10 = vector.load %arg2[%c2, %c0_8, %c0_9] : memref<3x16x16xbf16, #tpu.memory_space<vmem>>, vector<1x16x16xbf16>
    %11 = vector.shape_cast %10 : vector<1x16x16xbf16> to vector<16x16xbf16>
    %cst_10 = arith.constant dense<0.000000e+00> : vector<16x128xf32>
    %12 = tpu.matmul %11, %1, %cst_10 {dimension_numbers = #tpu.dot_dimension_numbers<[1], [0], [0], [1], [0, 0, 1, 1], [], []>} : vector<16x16xbf16>, vector<16x128xbf16>, vector<16x128xf32> -> vector<16x128xf32>
    %13 = arith.truncf %12 : vector<16x128xf32> to vector<16x128xbf16>
    %14 = tpu.concatenate %5, %1, %9, %13 in 1 : vector<16x128xbf16>, vector<16x128xbf16>, vector<16x128xbf16>, vector<16x128xbf16> -> vector<16x512xbf16>
    %c0_11 = arith.constant 0 : index
    %c0_12 = arith.constant 0 : index
    %15 = vector.load %arg3[%c0_11, %c0_12] : memref<512x128xbf16, #tpu.memory_space<vmem>>, vector<512x128xbf16>
    %cst_13 = arith.constant dense<0.000000e+00> : vector<16x128xf32>
    %16 = tpu.matmul %14, %15, %cst_13 {dimension_numbers = #tpu.dot_dimension_numbers<[1], [0], [0], [1], [0, 0, 1, 1], [], []>} : vector<16x512xbf16>, vector<512x128xbf16>, vector<16x128xf32> -> vector<16x128xf32>
    %c0_14 = arith.constant 0 : index
    %c0_15 = arith.constant 0 : index
    %17 = vector.load %arg4[%c0_14, %c0_15] : memref<1x128xf32, #tpu.memory_space<vmem>>, vector<1x128xf32>
    %18 = vector.broadcast %17 : vector<1x128xf32> to vector<16x128xf32>
    %19 = arith.addf %16, %18 : vector<16x128xf32>
    %cst_16 = arith.constant 0.000000e+00 : f32
    %20 = vector.broadcast %cst_16 : f32 to vector<16x128xf32>
    %21 = arith.maximumf %19, %20 : vector<16x128xf32>
    %22 = arith.truncf %21 : vector<16x128xf32> to vector<16x128xbf16>
    %c0_17 = arith.constant 0 : index
    %c0_18 = arith.constant 0 : index
    %23 = vector.load %arg5[%c0_17, %c0_18] : memref<128x128xbf16, #tpu.memory_space<vmem>>, vector<128x128xbf16>
    %cst_19 = arith.constant dense<0.000000e+00> : vector<16x128xf32>
    %24 = tpu.matmul %22, %23, %cst_19 {dimension_numbers = #tpu.dot_dimension_numbers<[1], [0], [0], [1], [0, 0, 1, 1], [], []>} : vector<16x128xbf16>, vector<128x128xbf16>, vector<16x128xf32> -> vector<16x128xf32>
    %c0_20 = arith.constant 0 : index
    %c0_21 = arith.constant 0 : index
    %25 = vector.load %arg6[%c0_20, %c0_21] : memref<1x128xf32, #tpu.memory_space<vmem>>, vector<1x128xf32>
    %26 = vector.broadcast %25 : vector<1x128xf32> to vector<16x128xf32>
    %27 = arith.addf %24, %26 : vector<16x128xf32>
    %28 = arith.negf %27 : vector<16x128xf32>
    %29 = math.exp %28 : vector<16x128xf32>
    %cst_22 = arith.constant 1.000000e+00 : f32
    %30 = vector.broadcast %cst_22 : f32 to vector<16x128xf32>
    %31 = arith.addf %30, %29 : vector<16x128xf32>
    %32 = arith.divf %30, %31 : vector<16x128xf32>
    %33 = vector.shape_cast %32 : vector<16x128xf32> to vector<1x16x128xf32>
    %c0_23 = arith.constant 0 : index
    %c0_24 = arith.constant 0 : index
    %c0_25 = arith.constant 0 : index
    %34 = vector.load %arg7[%c0_23, %c0_24, %c0_25] : memref<1x16x128xf32, #tpu.memory_space<vmem>>, vector<1x16x128xf32>
    tpu.vector_store %arg7[%c0_23, %c0_24, %c0_25], %33 {strides = array<i32>} : memref<1x16x128xf32, #tpu.memory_space<vmem>>, vector<1x16x128xf32>,
    return
  }
  func.func @transform_0(%arg0: i32) -> (i32, i32, i32) {
    %c0_i32 = arith.constant 0 : i32
    %c0_i32_0 = arith.constant 0 : i32
    %c0_i32_1 = arith.constant 0 : i32
    return %arg0, %c0_i32, %c0_i32_0 : i32, i32, i32
  }
  func.func @transform_1(%arg0: i32) -> (i32, i32, i32) {
    %c0_i32 = arith.constant 0 : i32
    %c0_i32_0 = arith.constant 0 : i32
    %c0_i32_1 = arith.constant 0 : i32
    %c0_i32_2 = arith.constant 0 : i32
    return %c0_i32, %c0_i32_0, %c0_i32_1 : i32, i32, i32
  }
  func.func @transform_2(%arg0: i32) -> (i32, i32) {
    %c0_i32 = arith.constant 0 : i32
    %c0_i32_0 = arith.constant 0 : i32
    %c0_i32_1 = arith.constant 0 : i32
    return %c0_i32, %c0_i32_0 : i32, i32
  }
  func.func @transform_3(%arg0: i32) -> (i32, i32) {
    %c0_i32 = arith.constant 0 : i32
    %c0_i32_0 = arith.constant 0 : i32
    %c0_i32_1 = arith.constant 0 : i32
    return %c0_i32, %c0_i32_0 : i32, i32
  }
  func.func @transform_4(%arg0: i32) -> (i32, i32) {
    %c0_i32 = arith.constant 0 : i32
    %c0_i32_0 = arith.constant 0 : i32
    %c0_i32_1 = arith.constant 0 : i32
    return %c0_i32, %c0_i32_0 : i32, i32
  }
  func.func @transform_5(%arg0: i32) -> (i32, i32) {
    %c0_i32 = arith.constant 0 : i32
    %c0_i32_0 = arith.constant 0 : i32
    %c0_i32_1 = arith.constant 0 : i32
    return %c0_i32, %c0_i32_0 : i32, i32
  }
  func.func @transform_6(%arg0: i32) -> (i32, i32, i32) {
    %c0_i32 = arith.constant 0 : i32
    %c0_i32_0 = arith.constant 0 : i32
    %c0_i32_1 = arith.constant 0 : i32
    return %arg0, %c0_i32, %c0_i32_0 : i32, i32, i32
  }
}

</mosaic_0001>

<bundles_post_ra>
// kernel: tpu_custom_call.1
= control target key start
LH: loop header
LB: loop body
LE: loop exit
PB: predicated region body
PF: predicated region fallthrough
CT: control target
= control target key end

     0   :  { %11 = vsyncpa [#allocation3], 0  ;;  %s1913_s0 = inlined_call_operand.hbm [shape: bf16[2,16,128], index: 0, kind: input, shape index: {}]   ;;  %s1914_s1 = inlined_call_operand.hbm [shape: bf16[3,16,16], index: 1, kind: input, shape index: {}]   ;;  %s1915_s2 = inlined_call_operand.hbm [shape: bf16[512,128], index: 2, kind: input, shape index: {}]   ;;  %s1916_s3 = inlined_call_operand.vmem [shape: f32[1,128], index: 3, kind: input, shape index: {}]   ;;  %s1917_s4 = inlined_call_operand.hbm [shape: bf16[128,128], index: 4, kind: input, shape index: {}]   ;;  %s1918_s5 = inlined_call_operand.vmem [shape: f32[1,128], index: 5, kind: input, shape index: {}]   ;;  %s1919_s6 = inlined_call_operand.hbm [shape: f32[2,16,128], index: 6, kind: output, shape index: {}]  }
   0x1   :  { %13 = vsyncpa [#allocation3 + $0x1], 0 }
   0x2   :  { %14 = vsyncpa [#allocation6], 0 }
   0x3   :  { %15 = vsyncpa [#allocation9], 0 }
   0x4   :  { %16 = vsyncpa [#allocation4], 0 }
   0x5   :  { %18 = vsyncpa [#allocation4 + $0x1], 0  ;;  %s1613_s21 = smov 0   ;;  %s1615_s22 = smov 0  }
   0x6   :  { %s1617_s23 = smov 0   ;;  %s1619_s24 = smov 0  }
   0x7 LB: > { %s1634_s25 = sadd.s32 4294967295, %s1565_s24   ;;  %s1072_s26 = sadd.s32 4294967294, %s1565_s24   ;;  %s1565_s24 = sphi %s1619_s24, %s1942_s24   ;;  %s1561_s23 = sphi %s1617_s23, %s1941_s23   ;;  %s1557_s22 = sphi %s1615_s22, %s1940_s22   ;;  %s1553_s21 = sphi %s1613_s21, %s1939_s21  }
   0x8   : > { %p44_p0 = scmp.ne.s32.totalorder %s1557_s22, %s1553_s21  ;;  %p1920_p1 = scmp.eq.s32.totalorder %s1634_s25, 0 }
   0x9   : > { %p179_p3 = scmp.eq.s32.totalorder %s1072_s26, 1  ;;  %p1073_p5 = scmp.ge.s32.totalorder %s1565_s24, 1 }
   0xa   : > { %p1643_p4 = por %p1920_p1, %p44_p0  ;;  %p186_p7 = scmp.lt.s32.totalorder %s1565_s24, 3 }
   0xb   : > { %p1648_p6 = por %p179_p3, %p44_p0  ;;  %s1567_s30 = smov [#allocation5]  }
   0xc   : > { %s1923_s27 = scalar_select %p1643_p4, 1, 0 }
   0xd   : > { %s1924_s28 = scalar_select %p1648_p6, 1, 0 }
   0xe   : > { %p1653_p8 = pnand %p1073_p5, %p186_p7  ;;  %s198_s7 = sshll.u32 %s1567_s30, 4  ;;  %s1657_s7 = int_to_ptr.vmem [resolvable:$true] %s198_s7 }
   0xf   : > { %s1568_s9 = smov [#allocation7]   ;;  %s1569_s11 = smov [#allocation8]  }
  0x10   : > { %s1925_s29 = scalar_select %p1653_p8, 1, 0 }
  0x11   : > { %p1258_p9 = pneg %p1653_p8  ;;  %s211_s10 = sshll.u32 %s1568_s9, 4  ;;  %s1668_s10 = int_to_ptr.vmem [resolvable:$true] %s211_s10 }
  0x12   : > { %s1670_s12 = sshll.u32 %s1569_s11, 4  ;;  %s1377_s15 = scalar_lea.hbm %s1914_s1, 384  ;;  %s228_s12 = int_to_ptr.vmem [resolvable:$true] %s1670_s12 }
  0x13   : > { %p1664_p11 = pnand %p1258_p9, %p1920_p1  ;;  %p1378_p12 = scmp.ne.s32.totalorder %s1914_s1, %s1377_s15 }
  0x14   : > { %p1384_p5 = scmp.lt.u32.totalorder %s1377_s15, %s1914_s1 }
  0x15   : > { %p1680_p13 = pneg %p1664_p11 }
  0x17   : > { %p1380_p0 = pnand %p1680_p13, %p1378_p12 }
  0x19   : > { %p1381_p3 = pneg %p1380_p0 }
  0x1b   : > { %p1386_p7 = pnand %p1384_p5, %p1381_p3 }
  0x1d   : > { %1389 = shalt.err (!%p1386_p7)
}
  0x1e   : > { %s1390_s26 = scalar_lea.vmem %s1657_s7, 384  ;;  %p1398_p2 = scmp.lt.s32.totalorder %s1657_s7, %s1657_s7 }
  0x1f   : > { %p1391_p9 = scmp.ne.s32.totalorder %s1657_s7, %s1390_s26  ;;  %p1399_p6 = scmp.lt.s32.totalorder %s1390_s26, %s1390_s26 }
  0x21   : > { %p1393_p10 = pnand %p1391_p9, %p1680_p13  ;;  %p1400_p12 = por %p1399_p6, %p1398_p2 }
  0x23   : > { %p1394_p1 = pneg %p1393_p10 }
  0x25   : > { %p1401_p0 = pnand %p1400_p12, %p1394_p1 }
  0x27   : > { %1404 = shalt.err (!%p1401_p0)
}
  0x28   : > { %s1570_s30 = smov 64   ;;  %s1571_s9 = smov 4  }
  0x29   : > { %1261 = dma.hbm_to_vmem [thread:$0]  (!%p1664_p11), %s1914_s1, 384, %s1657_s7, [#allocation6], %s1570_s30, %s1570_s30, %s1571_s9  }
  0x2a   : > { %s1405_s16 = scalar_lea.hbm %s1915_s2, 4096 }
  0x2b   : > { %p1406_p1 = scmp.ne.s32.totalorder %s1915_s2, %s1405_s16  ;;  %p1412_p10 = scmp.lt.u32.totalorder %s1405_s16, %s1915_s2 }
  0x2d   : > { %p1408_p2 = pnand %p1406_p1, %p1680_p13 }
  0x2f   : > { %p1409_p6 = pneg %p1408_p2 }
  0x31   : > { %p1414_p3 = pnand %p1412_p10, %p1409_p6 }
  0x33   : > { %1417 = shalt.err (!%p1414_p3)
}
  0x34   : > { %s1418_s7 = scalar_lea.vmem %s1668_s10, 4096  ;;  %p1426_p12 = scmp.lt.s32.totalorder %s1668_s10, %s1668_s10 }
  0x35   : > { %p1419_p5 = scmp.ne.s32.totalorder %s1668_s10, %s1418_s7  ;;  %p1427_p0 = scmp.lt.s32.totalorder %s1418_s7, %s1418_s7 }
  0x37   : > { %p1421_p7 = pnand %p1419_p5, %p1680_p13  ;;  %p1428_p1 = por %p1427_p0, %p1426_p12 }
  0x39   : > { %p1422_p9 = pneg %p1421_p7 }
  0x3b   : > { %p1429_p2 = pnand %p1428_p1, %p1422_p9 }
  0x3d   : > { %1432 = shalt.err (!%p1429_p2)
}
  0x3e   : > { %1264 = dma.hbm_to_vmem [thread:$0]  (!%p1664_p11), %s1915_s2, 4096, %s1668_s10, [#allocation6], %s1570_s30, %s1570_s30, %s1571_s9  }
  0x3f   : > { %s1433_s16 = scalar_lea.hbm %s1917_s4, 1024 }
  0x40   : > { %p1434_p6 = scmp.ne.s32.totalorder %s1917_s4, %s1433_s16  ;;  %p1440_p5 = scmp.lt.u32.totalorder %s1433_s16, %s1917_s4 }
  0x42   : > { %p1436_p10 = pnand %p1434_p6, %p1680_p13 }
  0x44   : > { %p1437_p3 = pneg %p1436_p10 }
  0x46   : > { %p1442_p7 = pnand %p1440_p5, %p1437_p3 }
  0x48   : > { %1445 = shalt.err (!%p1442_p7)
}
  0x49   : > { %s1446_s7 = scalar_lea.vmem %s228_s12, 1024  ;;  %p1454_p1 = scmp.lt.s32.totalorder %s228_s12, %s228_s12 }
  0x4a   : > { %p1447_p9 = scmp.ne.s32.totalorder %s228_s12, %s1446_s7  ;;  %p1455_p2 = scmp.lt.s32.totalorder %s1446_s7, %s1446_s7 }
  0x4c   : > { %p1449_p12 = pnand %p1447_p9, %p1680_p13  ;;  %p1456_p4 = por %p1455_p2, %p1454_p1 }
  0x4e   : > { %p1450_p0 = pneg %p1449_p12 }
  0x50   : > { %p1457_p8 = pnand %p1456_p4, %p1450_p0 }
  0x52   : > { %1460 = shalt.err (!%p1457_p8)
}
  0x53   : > { %1267 = dma.hbm_to_vmem [thread:$0]  (!%p1664_p11), %s1917_s4, 1024, %s228_s12, [#allocation9], %s1570_s30, %s1570_s30, %s1571_s9  }
  0x54   : > { %s1753_s18 = sadd.s32 1, %s1565_s24   ;;  %s31_s13 = sadd.s32 1, %s1561_s23 }
  0x55   : > { %s28_s8 = ssub.s32 %s1565_s24, %s1753_s18  ;;  %p38_p8 = scmp.ne.s32.totalorder %s1561_s23, %s1557_s22 }
  0x56   : > { %p29_p4 = scmp.eq.s32.totalorder %s28_s8, 0  ;;  %p39_p13 = scmp.eq.s32.totalorder %s1565_s24, 0 }
  0x57   : > { %p1279_p6 = scmp.lt.s32.totalorder %s1565_s24, 2  ;;  %p1928_p3 = scmp.eq.s32.totalorder %s1634_s25, 1 }
  0x58   : > { %s1763_s14 = scalar_select %p29_p4, %s1561_s23, %s31_s13  }
  0x59   : > { %p40_p10 = por %p39_p13, %p38_p8  ;;  %p1767_p5 = por %p1928_p3, %p38_p8 }
  0x5a   : > { %s244_s16 = sand.u32 1, %s1561_s23   ;;  %s1143_s17 = sshll.u32 %s1565_s24, 7 }
  0x5b   : > { %s1078_s12 = sshll.u32 %s244_s16, 3  ;;  %s1776_s26 = scalar_lea.hbm %s1913_s0, %s1143_s17 }
  0x5c   : > { %s248_s7 = scalar_lea.vmem [#allocation2], %s1078_s12  ;;  %p1778_p11 = pnand %p1279_p6, %p40_p10 }
  0x5d   : > { %s255_s10 = sshll.u32 %s248_s7, 4  ;;  %s1784_s8 = scalar_lea.sflag [#allocation3], %s244_s16  ;;  %s1782_s10 = int_to_ptr.vmem [resolvable:$true] %s255_s10 }
  0x5e   : > { %s1461_s13 = scalar_lea.hbm %s1776_s26, 128  ;;  %p1463_p9 = pneg %p1778_p11 }
  0x5f   : > { %p1462_p7 = scmp.ne.s32.totalorder %s1776_s26, %s1461_s13  ;;  %s1466_s19 = scalar_lea.hbm %s1913_s0, 256 }
  0x60   : > { %p1467_p1 = scmp.lt.u32.totalorder %s1776_s26, %s1913_s0  ;;  %p1468_p2 = scmp.lt.u32.totalorder %s1466_s19, %s1461_s13 }
  0x61   : > { %p1464_p12 = pnand %p1463_p9, %p1462_p7  ;;  %p1470_p8 = scmp.lt.u32.totalorder %s1461_s13, %s1776_s26 }
  0x62   : > { %p1469_p4 = por %p1468_p2, %p1467_p1 }
  0x63   : > { %p1465_p0 = pneg %p1464_p12 }
  0x64   : > { %p1471_p13 = por %p1470_p8, %p1469_p4 }
  0x66   : > { %p1472_p6 = pnand %p1471_p13, %p1465_p0 }
  0x68   : > { %1475 = shalt.err (!%p1472_p6)
}
  0x69   : > { %s1476_s16 = scalar_lea.vmem %s1782_s10, 128  ;;  %s1572_s17 = smov [#allocation2]  }
  0x6a   : > { %p1477_p10 = scmp.ne.s32.totalorder %s1782_s10, %s1476_s16  ;;  %s1481_s12 = sshll.u32 %s1572_s17, 4  ;;  %s1482_s12 = int_to_ptr.vmem [resolvable:$false] %s1481_s12 }
  0x6b   : > { %s1483_s20 = scalar_lea.vmem %s1482_s12, 256  ;;  %p1484_p12 = scmp.lt.s32.totalorder %s1782_s10, %s1482_s12 }
  0x6c   : > { %p1479_p3 = pnand %p1477_p10, %p1463_p9  ;;  %p1485_p1 = scmp.lt.s32.totalorder %s1483_s20, %s1476_s16 }
  0x6e   : > { %p1480_p7 = pneg %p1479_p3  ;;  %p1486_p2 = por %p1485_p1, %p1484_p12 }
  0x70   : > { %p1487_p4 = pnand %p1486_p2, %p1480_p7 }
  0x72   : > { %1490 = shalt.err (!%p1487_p4)
}
  0x73   : > { %1271 = dma.hbm_to_vmem [thread:$0]  (!%p1778_p11), %s1776_s26, 128, %s1782_s10, %s1784_s8, %s1570_s30, %s1570_s30, %s1571_s9  }
  0x74   : > { %p1931_p9 = scmp.ne.s32.totalorder %s1925_s29, 0 }
  0x75   : > { %s1818_s13 = sand.u32 (!%p1931_p9), 1, %s1557_s22   ;;  %p1932_p0 = scmp.ne.s32.totalorder (!%p1931_p9), %s1923_s27, 0 }
  0x76   : > { %267 = sbr.rel (%p1931_p9) target bundleno = 850 (0x352), region = 44  ;;  %s1082_s19 = sshll.u32 (!%p1931_p9), %s1818_s13, 3 }
  0x77   : > { %s270_s7 = scalar_lea.sflag (!%p1931_p9), [#allocation3], %s1818_s13  ;;  %s273_s16 = scalar_lea.vmem (!%p1931_p9), [#allocation2], %s1082_s19 }
  0x7d   : > { %1536 = dma.done.wait (%p1932_p0), %s270_s7, 128  }
  0x7e   : > { %1538 = vsyncadd (%p1932_p0), %s270_s7, 4294967168  ;;  %p1933_p8 = scmp.eq.s32.totalorder %s1634_s25, 0 }
  0x80   : > { %1540 = dma.done.wait (%p1933_p8), [#allocation6], 4480   ;;  %p1934_p11 = pmov %p1933_p8 }
  0x81   : > { %p1935_p13 = pmov %p1933_p8 }
  0x82   : > { %1542 = vsyncadd (%p1934_p11), [#allocation6], 4294962816 }
  0x83   : > { %1544 = dma.done.wait (%p1935_p13), [#allocation9], 1024   ;;  %p1936_p6 = pmov %p1933_p8 }
  0x84   : > { %v1573_v0 = vmov 0.0   ;;  %vm1574_vm0 = vmmov 0   ;;  %v1325_v1 = vld [vmem:[%s273_s16] sm:$0xff]   ;;  %v1326_v2 = vld [vmem:[#allocation5] sm:$0xff]   ;;  %vm330_vm1 = vcmask 130048   ;;  %v1327_v6 = vld [vmem:[#allocation5 + $0x8] sm:$0xff]  }
  0x85   : > { %1546 = vsyncadd (%p1936_p6), [#allocation9], 4294966272  ;;  %1204 = vmatprep.subr.bf16.mxu0 %v1573_v0  ;;  %1206 = vmatprep.mubr.msk.bf16.mxu0 %vm1574_vm0, %v1573_v0  ;;  %v1329_v3 = vld [vmem:[#allocation7 + $0x40] sm:$0xff]   ;;  %v1331_v5 = vld [vmem:[#allocation7 + $0x48] sm:$0xff]   ;;  %s1086_s26 = sshll.u32 %s1818_s13, 4  ;;  %s1144_s10 = sshll.u32 %s1634_s25, 8 }
  0x86   : > { %1205 = vmatpush3.bf16.msra.mxu0 %v1325_v1  ;;  %777 = vmatprep.mubr.bf16.mxu1 %v1325_v1  ;;  %v1330_v4 = vld [vmem:[#allocation7] sm:$0xff]   ;;  %v1332_v7 = vld [vmem:[#allocation7 + $0x8] sm:$0xff]   ;;  %v1333_v8 = vld [vmem:[#allocation7 + $0x50] sm:$0xff]   ;;  %s313_s11 = scalar_lea.vmem [#allocation10], %s1086_s26  ;;  %s1867_s20 = scalar_lea.hbm %s1919_s6, %s1144_s10 }
  0x87   : > { %1210 = vmatprep.subr.bf16.mxu0 %v1573_v0  ;;  %1151 = vmatprep.subr.bf16.mxu1 %v1329_v3  ;;  %v1334_v9 = vld [vmem:[#allocation7 + $0x10] sm:$0xff]   ;;  %v1335_v10 = vld [vmem:[#allocation7 + $0x58] sm:$0xff]   ;;  %v1339_v11 = vld [vmem:[#allocation7 + $0xc0] sm:$0xff]   ;;  %s970_s8 = sshll.u32 %s313_s11, 4  ;;  %s957_s19 = scalar_lea.sflag [#allocation4], %s1818_s13  ;;  %s1869_s8 = int_to_ptr.vmem [resolvable:$true] %s970_s8 }
  0x88   : > { %1152 = vmatpush3.bf16.msra.mxu1 %v1330_v4  ;;  %v1328_v12 = vld [vmem:[#allocation5 + $0x10] sm:$0xff]   ;;  %v1337_v14 = vld [vmem:[#allocation7 + $0x60] sm:$0xff]   ;;  %v1343_v16 = vld [vmem:[#allocation7 + $0xc8] sm:$0xff]   ;;  %s1491_s7 = scalar_lea.vmem %s1869_s8, 256  ;;  %s1575_s25 = smov [#allocation10]  }
  0x89   : > { %1207 = vmatmul.mubr.msk.bf16.vlgmr.msra.gmra.mrb[0].mxu0 %vm330_vm1, %v1326_v2  ;;  %1153 = vmatprep.subr.bf16.mxu1 %v1331_v5  ;;  %v1336_v13 = vld [vmem:[#allocation7 + $0x18] sm:$0xff]   ;;  %v1340_v15 = vld [vmem:[#allocation7 + $0x80] sm:$0xff]   ;;  %v1341_v18 = vld [vmem:[#allocation7 + $0x68] sm:$0xff]   ;;  %p1492_p10 = scmp.ne.s32.totalorder %s1869_s8, %s1491_s7  ;;  %s1495_s16 = sshll.u32 %s1575_s25, 4  ;;  %s1496_s16 = int_to_ptr.vmem [resolvable:$false] %s1495_s16 }
  0x8a   : > { %1211 = vmatpush3.bf16.msra.mxu0 %v1325_v1  ;;  %1212 = vmatprep.mubr.msk.bf16.mxu0 %vm1574_vm0, %v1573_v0  ;;  %v1338_v17 = vld [vmem:[#allocation7 + $0x20] sm:$0xff]   ;;  %v1342_v19 = vld [vmem:[#allocation7 + $0x28] sm:$0xff]   ;;  %v1345_v21 = vld [vmem:[#allocation7 + $0x70] sm:$0xff]   ;;  %s1497_s27 = scalar_lea.vmem %s1496_s16, 512  ;;  %p1498_p12 = scmp.lt.s32.totalorder %s1869_s8, %s1496_s16 }
  0x8b   : > { %1216 = vmatprep.subr.bf16.mxu0 %v1573_v0  ;;  %v1344_v20 = vld [vmem:[#allocation7 + $0x88] sm:$0xff]   ;;  %v1347_v22 = vld [vmem:[#allocation7 + $0xd0] sm:$0xff]   ;;  %v1349_v25 = vld [vmem:[#allocation7 + $0x78] sm:$0xff]   ;;  %p1493_p3 = pnand %p1492_p10, %p1767_p5  ;;  %p1499_p1 = scmp.lt.s32.totalorder %s1497_s27, %s1491_s7 }
  0x8c   : > { %1154 = vmatpush3.bf16.msra.mxu1 %v1332_v7  ;;  %v1348_v23 = vld [vmem:[#allocation7 + $0x90] sm:$0xff]   ;;  %v1350_v26 = vld [vmem:[#allocation7 + $0x38] sm:$0xff]   ;;  %v1353_v29 = vld [vmem:[#allocation7 + $0xe0] sm:$0xff]  }
  0x8d   : > { %1155 = vmatprep.subr.bf16.mxu1 %v1333_v8  ;;  %v1346_v24 = vld [vmem:[#allocation7 + $0x30] sm:$0xff]   ;;  %v1351_v27 = vld [vmem:[#allocation7 + $0xd8] sm:$0xff]   ;;  %v1354_v30 = vld [vmem:[#allocation7 + $0xa0] sm:$0xff]   ;;  %p1494_p7 = pneg %p1493_p3  ;;  %p1500_p2 = por %p1499_p1, %p1498_p12 }
  0x8e   : > { %v1352_v28 = vld [vmem:[#allocation7 + $0x98] sm:$0xff]   ;;  %v1355_v31 = vld [vmem:[#allocation7 + $0xe8] sm:$0xff]   ;;  %v1357_v33 = vld [vmem:[#allocation7 + $0xf0] sm:$0xff]  }
  0x8f   : > { %v1356_v32 = vld [vmem:[#allocation7 + $0xa8] sm:$0xff]   ;;  %v1358_v34 = vld [vmem:[#allocation7 + $0xb0] sm:$0xff]   ;;  %v1359_v35 = vld [vmem:[#allocation7 + $0xf8] sm:$0xff]   ;;  %p1501_p4 = pnand %p1500_p2, %p1494_p7 }
  0x90   : > { %1156 = vmatpush3.bf16.msra.mxu1 %v1334_v9  ;;  %v1360_v36 = vld [vmem:[#allocation7 + $0xb8] sm:$0xff]   ;;  %v1361_v40 = vld [vmem:[#allocation8] sm:$0xff]   ;;  %v1362_v53 = vld [vmem:[#allocation8 + $0x8] sm:$0xff]  }
  0x91   : > { %1213 = vmatmul.mubr.msk.bf16.vlgmr.msra.gmra.mrb[4].mxu0 %vm330_vm1, %v1327_v6  ;;  %1157 = vmatprep.subr.bf16.mxu1 %v1335_v10  ;;  %v1363_v54 = vld [vmem:[#allocation8 + $0x10] sm:$0xff]   ;;  %v1364_v55 = vld [vmem:[#allocation8 + $0x18] sm:$0xff]   ;;  %v1365_v56 = vld [vmem:[#allocation8 + $0x20] sm:$0xff]  }
  0x92   : > { %1217 = vmatpush3.bf16.msra.mxu0 %v1325_v1  ;;  %1218 = vmatprep.mubr.msk.bf16.mxu0 %vm1574_vm0, %v1573_v0  ;;  %v1366_v57 = vld [vmem:[#allocation8 + $0x28] sm:$0xff]   ;;  %v1367_v58 = vld [vmem:[#allocation8 + $0x30] sm:$0xff]   ;;  %v1368_v59 = vld [vmem:[#allocation8 + $0x38] sm:$0xff]  }
  0x93   : > { %1173 = vmatprep.subr.bf16.mxu0 %v1339_v11  ;;  %v1094_v3 = vld [vmem:[%s1916_s3] ss:$0 sm:$0xff] }
  0x94   : > { %1158 = vmatpush3.bf16.msra.mxu1 %v1336_v13 }
  0x95   : > { %1159 = vmatprep.subr.bf16.mxu1 %v1337_v14 }
  0x98   : > { %1160 = vmatpush3.bf16.msra.mxu1 %v1338_v17 }
  0x99   : > { %1219 = vmatmul.mubr.msk.bf16.vlgmr.msra.gmra.mrb[8].mxu0 %vm330_vm1, %v1328_v12  ;;  %1161 = vmatprep.subr.bf16.mxu1 %v1341_v18 }
  0x9a   : > { %1174 = vmatpush3.bf16.msra.mxu0 %v1340_v15 }
  0x9b   : > { %1175 = vmatprep.subr.bf16.mxu0 %v1343_v16  ;;  %v1127_v16 = vld [vmem:[%s1918_s5] ss:$0 sm:$0xff] }
  0x9c   : > { %1162 = vmatpush3.bf16.msra.mxu1 %v1342_v19 }
  0x9d   : > { %1163 = vmatprep.subr.bf16.mxu1 %v1345_v21 }
  0x9e   : > { %1176 = vmatpush3.bf16.msra.mxu0 %v1344_v20 }
  0x9f   : > { %1177 = vmatprep.subr.bf16.mxu0 %v1347_v22 }
  0xa0   : > { %1164 = vmatpush3.bf16.msra.mxu1 %v1346_v24 }
  0xa1   : > { %1165 = vmatprep.subr.bf16.mxu1 %v1349_v25 }
  0xa2   : > { %1178 = vmatpush3.bf16.msra.mxu0 %v1348_v23 }
  0xa3   : > { %1179 = vmatprep.subr.bf16.mxu0 %v1351_v27 }
  0xa4   : > { %1166 = vmatpush3.bf16.msra.mxu1 %v1350_v26 }
  0xa5   : > { %1222 = vmatprep.subr.bf16.mxu1 %v1573_v0 }
  0xa6   : > { %1180 = vmatpush3.bf16.msra.mxu0 %v1352_v28 }
  0xa7   : > { %1181 = vmatprep.subr.bf16.mxu0 %v1353_v29 }
  0xaa   : > { %1182 = vmatpush3.bf16.msra.mxu0 %v1354_v30 }
  0xab   : > { %1183 = vmatprep.subr.bf16.mxu0 %v1355_v31 }
  0xae   : > { %1184 = vmatpush3.bf16.msra.mxu0 %v1356_v32 }
  0xaf   : > { %1185 = vmatprep.subr.bf16.mxu0 %v1357_v33 }
  0xb2   : > { %1186 = vmatpush3.bf16.msra.mxu0 %v1358_v34 }
  0xb3   : > { %1187 = vmatprep.subr.bf16.mxu0 %v1359_v35 }
  0xb6   : > { %1188 = vmatpush3.bf16.msra.mxu0 %v1360_v36 }
 0x15c   : > { %v368_v37 = vpop.f32.mrb[0].mxu0 }
 0x15d   : > { %v1208_v38 = vpop.f32.mrb[1].mxu0 }
 0x15e   : > { %v371_v39 = vpop.f32.mrb[2].mxu0 }
 0x15f   : > { %v375_v41 = vpack.c.bf16 %v371_v39, %v368_v37  ;;  %v1209_v42 = vpop.f32.mrb[3].mxu0 }
 0x161   : > { %778 = vmatmul.mubr.bf16.vlgmr.msra.gmra.mrb[0].mxu1 %v375_v41 }
 0x162   : > { %1223 = vmatpush3.bf16.msra.mxu1 %v1361_v40  ;;  %1238 = vmatprep.mubr.msk.bf16.mxu1 %vm1574_vm0, %v1573_v0 }
 0x163   : > { %1224 = vmatprep.subr.bf16.mxu1 %v1573_v0 }
 0x164   : > { %v421_v43 = vpop.f32.mrb[4].mxu0 }
 0x165   : > { %v1214_v44 = vpop.f32.mrb[5].mxu0 }
 0x166   : > { %v424_v45 = vpop.f32.mrb[6].mxu0  ;;  %1225 = vmatpush3.bf16.msra.mxu1 %v1362_v53 }
 0x167   : > { %v428_v46 = vpack.c.bf16 %v424_v45, %v421_v43  ;;  %v1215_v47 = vpop.f32.mrb[7].mxu0  ;;  %1226 = vmatprep.subr.bf16.mxu1 %v1573_v0 }
 0x16a   : > { %1227 = vmatpush3.bf16.msra.mxu1 %v1363_v54 }
 0x16b   : > { %1228 = vmatprep.subr.bf16.mxu1 %v1573_v0 }
 0x16c   : > { %v474_v48 = vpop.f32.mrb[8].mxu0 }
 0x16d   : > { %v1220_v49 = vpop.f32.mrb[9].mxu0 }
 0x16e   : > { %v477_v50 = vpop.f32.mrb[10].mxu0  ;;  %1229 = vmatpush3.bf16.msra.mxu1 %v1364_v55 }
 0x16f   : > { %v481_v51 = vpack.c.bf16 %v477_v50, %v474_v48  ;;  %v1221_v52 = vpop.f32.mrb[11].mxu0  ;;  %1230 = vmatprep.subr.bf16.mxu1 %v1573_v0 }
 0x171   : > { %818 = vmatprep.mubr.bf16.mxu0 %v481_v51 }
 0x172   : > { %819 = vmatmul.mubr.bf16.vlgmr.msra.gmra.mrb[12].mxu0 %v428_v46  ;;  %1231 = vmatpush3.bf16.msra.mxu1 %v1365_v56 }
 0x173   : > { %1232 = vmatprep.subr.bf16.mxu1 %v1573_v0 }
 0x176   : > { %1233 = vmatpush3.bf16.msra.mxu1 %v1366_v57 }
 0x177   : > { %1234 = vmatprep.subr.bf16.mxu1 %v1573_v0 }
 0x17a   : > { %1235 = vmatpush3.bf16.msra.mxu1 %v1367_v58 }
 0x17b   : > { %1236 = vmatprep.subr.bf16.mxu1 %v1573_v0 }
 0x17e   : > { %1237 = vmatpush3.bf16.msra.mxu1 %v1368_v59 }
 0x234   : > { %v1167_v60 = vpop.f32.mrb[0].mxu1 }
 0x235   : > { %v1168_v61 = vpop.f32.mrb[1].mxu1 }
 0x236   : > { %v1169_v62 = vadd.f32 %v1168_v61, %v1167_v60  ;;  %v1170_v63 = vpop.f32.mrb[2].mxu1 }
 0x237   : > { %v1171_v1 = vpop.f32.mrb[3].mxu1 }
 0x238   : > { %v1172_v2 = vadd.f32 %v1171_v1, %v1170_v63  ;;  %v780_v6 = vadd.f32 %v1169_v62, %v1094_v3 }
 0x23a   : > { %v783_v10 = vadd.f32 %v1172_v2, %v1094_v3 }
 0x245   : > { %v1189_v4 = vpop.f32.mrb[12].mxu0 }
 0x246   : > { %v1190_v5 = vpop.f32.mrb[13].mxu0 }
 0x247   : > { %v1191_v7 = vadd.f32 %v1190_v5, %v1189_v4  ;;  %v1192_v8 = vpop.f32.mrb[14].mxu0 }
 0x248   : > { %v1193_v9 = vpop.f32.mrb[15].mxu0 }
 0x249   : > { %v821_v0 = vadd.f32 %v1191_v7, %v780_v6  ;;  %v1194_v11 = vadd.f32 %v1193_v9, %v1192_v8 }
 0x24b   : > { %v824_v12 = vadd.f32 %v1194_v11, %v783_v10  ;;  %v827_v13 = vmax.f32 %v821_v0, 0.0 }
 0x24d   : > { %v828_v14 = vmax.f32 %v824_v12, 0.0 }
 0x24f   : > { %v829_v15 = vpack.c.bf16 %v828_v14, %v827_v13 }
 0x251   : > { %1239 = vmatmul.mubr.bf16.vlgmr.msra.gmra.mrb[4].mxu1 %v829_v15 }
 0x324   : > { %v935_v17 = vpop.f32.mrb[4].mxu1 }
 0x325   : > { %v936_v18 = vadd.f32 %v1127_v16, %v935_v17  ;;  %v1240_v19 = vpop.f32.mrb[5].mxu1 }
 0x326   : > { %v938_v20 = vpop.f32.mrb[6].mxu1 }
 0x327   : > { %v1136_v21 = vmul.f32 -1.442695, %v936_v18  ;;  %v939_v22 = vadd.f32 %v1127_v16, %v938_v20  ;;  %v1241_v23 = vpop.f32.mrb[7].mxu1 }
 0x329   : > { %1369 = vpow2.f32 %v1136_v21  ;;  %v1137_v24 = vmul.f32 -1.442695, %v939_v22 }
 0x32b   : > { %1371 = vpow2.f32 %v1137_v24 }
 0x333   : > { %v1370_v25 = vpop.eup %1369 }
 0x334   : > { %v948_v26 = vadd.f32 1.0, %v1370_v25 }
 0x335   : > { %v1372_v27 = vpop.eup %1371 }
 0x336   : > { %1373 = vrcp.f32 %v948_v26  ;;  %v949_v28 = vadd.f32 1.0, %v1372_v27 }
 0x338   : > { %1375 = vrcp.f32 %v949_v28 }
 0x340   : > { %v1374_v29 = vpop.eup %1373 }
 0x341   : > { %954 = vst [vmem:[%s313_s11] sm:$0xff] %v1374_v29 }
 0x342   : > { %v1376_v30 = vpop.eup %1375 }
 0x343   : > { %955 = vst [vmem:[%s313_s11 + $0x8] sm:$0xff] %v1376_v30 }
 0x344   : > { %1504 = shalt.err (!%p1501_p4)
}
 0x345   : > { %s1505_s29 = scalar_lea.hbm %s1867_s20, 256  ;;  %s1509_s26 = scalar_lea.hbm %s1919_s6, 512 }
 0x346   : > { %p1506_p9 = scmp.ne.s32.totalorder %s1867_s20, %s1505_s29  ;;  %p1510_p11 = scmp.lt.u32.totalorder %s1867_s20, %s1919_s6 }
 0x347   : > { %p1511_p13 = scmp.lt.u32.totalorder %s1509_s26, %s1505_s29  ;;  %p1513_p10 = scmp.lt.u32.totalorder %s1505_s29, %s1867_s20 }
 0x348   : > { %p1507_p0 = pnand %p1506_p9, %p1767_p5 }
 0x349   : > { %p1512_p6 = por %p1511_p13, %p1510_p11 }
 0x34a   : > { %p1508_p8 = pneg %p1507_p0 }
 0x34b   : > { %p1514_p3 = por %p1513_p10, %p1512_p6 }
 0x34d   : > { %p1515_p7 = pnand %p1514_p3, %p1508_p8 }
 0x34f   : > { %1518 = shalt.err (!%p1515_p7)
}
 0x350   : > { %s1576_s17 = smov 128   ;;  %s1577_s12 = smov 8  }
 0x351   : > { %1256 = dma.vmem_to_hbm [thread:$0]  (%p1767_p5), %s1869_s8, 256, %s1867_s20, %s957_s19, %s1576_s17, %s1576_s17, %s1577_s12  }
 0x352 PF: > { %s985_s7 = sand.u32 1, %s1553_s21   ;;  %p1937_p12 = scmp.ne.s32.totalorder %s1924_s28, 0 }
 0x353   : > { %p1938_p1 = scmp.ge.s32.totalorder %s1565_s24, 2  ;;  %s986_s25 = scalar_lea.sflag [#allocation4], %s985_s7 }
 0x355   : > { %p1273_p2 = pnand %p1938_p1, %p1937_p12 }
 0x357   : > { %1548 = dma.done.wait (!%p1273_p2), %s986_s25, 256  }
 0x358   : > { %1550 = vsyncadd (!%p1273_p2), %s986_s25, 4294967040  ;;  %p21_p4 = scmp.ge.s32.totalorder %s1753_s18, 4   ;;  %s1939_s21 = smov %s1557_s22 }
 0x359   : > { %s1940_s22 = smov %s1561_s23  ;;  %s1941_s23 = smov %s1763_s14 }
 0x35a   : > { %s1942_s24 = smov %s1753_s18  ;;  %23 = sbr.rel (!%p21_p4) target bundleno = 7 (0x7), region = 103 }
 0x361   :  { %991 = vsyncpa [#allocation3], 1 }
 0x362   :  { %993 = vsyncpa [#allocation3 + $0x1], 1 }
 0x363   :  { %994 = vsyncpa [#allocation6], 1 }
 0x364   :  { %995 = vsyncpa [#allocation9], 1 }
 0x365   :  { %996 = vsyncpa [#allocation4], 1 }
 0x366   :  { %998 = vsyncpa [#allocation4 + $0x1], 1 }

</bundles_post_ra>
